<compile_context>
chip_gen: v7x
topology: tpu7x:2x2x1
jax: 0.10.0
libtpu: 0.0.40
codegen_flags: <defaults>
</compile_context>

<pallas_src>
import functools

import jax
import jax.numpy as jnp
from jax.experimental import pallas as pl
from jax.experimental.pallas import tpu as pltpu


def _round_up(x, m):
    return (x + m - 1) // m * m


def _pick_batch_tile(batch, batch_tile):
    """Large tiles (per-grid-step overhead ~0.35us) but >= 2 grid steps when possible
    so the batch axis ("parallel") can shard across v7x's 2 TensorCores.  Multiple of
    16 so bf16 input/output tiles stay sublane-pack aligned."""
    tb = min(batch_tile, _round_up(pl.cdiv(batch, 2), 16))
    return max(tb, 16)


def _fused_ac_kernel(x_ref, w1_ref, b1_ref, w2_ref, b2_ref, w3_ref, b3_ref, out_ref):
    """Fused actor+critic 3-layer MLP on one batch tile.

    All hidden / output widths are lane-dense (128). Matmul inputs are bf16 with f32
    accumulation; bias adds and ReLU stay in f32; final store in out_ref.dtype (bf16).
    """
    x = x_ref[...]
    if x.dtype != jnp.bfloat16:          # static (trace-time) check; no-op for bf16 obs
        x = x.astype(jnp.bfloat16)
    h1 = jnp.dot(x, w1_ref[...], preferred_element_type=jnp.float32) + b1_ref[...]
    h1 = jnp.maximum(h1, 0.0)
    h2 = jnp.dot(h1.astype(jnp.bfloat16), w2_ref[...],
                 preferred_element_type=jnp.float32) + b2_ref[...]
    h2 = jnp.maximum(h2, 0.0)
    y = jnp.dot(h2.astype(jnp.bfloat16), w3_ref[...],
                preferred_element_type=jnp.float32) + b3_ref[...]
    out_ref[...] = y.astype(out_ref.dtype)


def _run_fused(x, fused_params, *, batch_tile=2048, out_dtype=jnp.bfloat16):
    """Run the fused actor+critic kernel. Returns a (B, out_pad) slab: [value|logits|0]."""
    w1, b1, w2, b2, w3, b3 = fused_params
    batch, num_inputs = x.shape
    hidden = w1.shape[1]
    out_pad = w3.shape[1]

    tb = _pick_batch_tile(batch, batch_tile)
    grid = (pl.cdiv(batch, tb),)   # ragged last block handled by Pallas (no pad/slice passes)

    def weight_spec(shape):
        # Weights map to block (0, 0) every grid step -> stay resident in VMEM.
        return pl.BlockSpec(shape, lambda i: (0, 0))

    out = pl.pallas_call(
        _fused_ac_kernel,
        out_shape=jax.ShapeDtypeStruct((batch, out_pad), out_dtype),
        grid=grid,
        in_specs=[
            pl.BlockSpec((tb, num_inputs), lambda i: (i, 0)),  # state tile (streamed)
            weight_spec((num_inputs, hidden)),                 # W1 (critic|actor concat)
            weight_spec((1, hidden)),                          # b1
            weight_spec((hidden, hidden)),                     # W2 (block-diagonal)
            weight_spec((1, hidden)),                          # b2
            weight_spec((hidden, out_pad)),                    # W3 (packed, lane-dense)
            weight_spec((1, out_pad)),                         # b3
        ],
        out_specs=pl.BlockSpec((tb, out_pad), lambda i: (i, 0)),
        compiler_params=pltpu.CompilerParams(
            dimension_semantics=("parallel",)),
    )(x, w1, b1, w2, b2, w3, b3)
    return out


def init_linear_params(key, sizes):
    """nn.Linear-style init (uniform(-1/sqrt(in), 1/sqrt(in))), weights as [in, out]."""
    params = []
    keys = jax.random.split(key, 2 * (len(sizes) - 1))
    for i in range(len(sizes) - 1):
        fan_in, fan_out = sizes[i], sizes[i + 1]
        bound = 1.0 / jnp.sqrt(jnp.float32(fan_in))
        w = jax.random.uniform(keys[2 * i], (fan_in, fan_out), jnp.float32, -bound, bound)
        b = jax.random.uniform(keys[2 * i + 1], (1, fan_out), jnp.float32, -bound, bound)
        params += [w, b]
    return tuple(params)


def fuse_actor_critic_params(critic_params, actor_params, num_actions):
    """Pack critic+actor weights into one lane-dense, block-diagonal parameter set.

    Off-diagonal / padding blocks are exact zeros, so both heads stay independent
    through the ReLUs (0-contributions are exact in bf16*bf16 + f32 accumulation).
    """
    cw1, cb1, cw2, cb2, cw3, cb3 = critic_params
    aw1, ab1, aw2, ab2, aw3, ab3 = actor_params
    hc, ha = cw1.shape[1], aw1.shape[1]
    hidden = hc + ha                                           # 64 + 64 = 128 lanes
    out_pad = max(128, _round_up(2 * num_actions, 128))        # lane-dense output slab

    w1 = jnp.concatenate([cw1, aw1], axis=1)                   # [in, hidden]
    b1 = jnp.concatenate([cb1, ab1], axis=1)                   # [1, hidden]
    w2 = jnp.zeros((hidden, hidden), jnp.float32)
    w2 = w2.at[:hc, :hc].set(cw2).at[hc:, hc:].set(aw2)        # block-diagonal
    b2 = jnp.concatenate([cb2, ab2], axis=1)
    w3 = jnp.zeros((hidden, out_pad), jnp.float32)
    w3 = w3.at[:hc, :num_actions].set(cw3)                     # value head -> cols [0, A)
    w3 = w3.at[hc:, num_actions:2 * num_actions].set(aw3)      # policy head -> cols [A, 2A)
    b3 = jnp.zeros((1, out_pad), jnp.float32)
    b3 = b3.at[:, :num_actions].set(cb3[0])
    b3 = b3.at[:, num_actions:2 * num_actions].set(ab3[0])

    # bf16 weights (MXU-native, halves weight DMA bytes); f32 biases for f32 add/ReLU.
    return (w1.astype(jnp.bfloat16), b1,
            w2.astype(jnp.bfloat16), b2,
            w3.astype(jnp.bfloat16), b3)


class ActorCriticMLPPallas:
    """JAX/Pallas port of avalanche_rl ActorCriticMLP (relu, default hidden sizes)."""

    def __init__(self, num_inputs, num_actions,
                 actor_hidden_sizes=(64, 64), critic_hidden_sizes=(64, 64),
                 key=jax.random.PRNGKey(0)):
        if isinstance(actor_hidden_sizes, int):
            actor_hidden_sizes = (actor_hidden_sizes,)
        if isinstance(critic_hidden_sizes, int):
            critic_hidden_sizes = (critic_hidden_sizes,)
        self.num_actions = num_actions
        kc, ka = jax.random.split(key)
        self.critic_params = init_linear_params(
            kc, [num_inputs, *critic_hidden_sizes, num_actions])
        self.actor_params = init_linear_params(
            ka, [num_inputs, *actor_hidden_sizes, num_actions])
        self.fused_params = fuse_actor_critic_params(
            self.critic_params, self.actor_params, num_actions)

    @functools.partial(jax.jit, static_argnums=(0, 2, 3))
    def forward(self, state, compute_policy=True, compute_value=True):
        a = self.num_actions
        slab = _run_fused(state, self.fused_params)        # (B, 128) bf16: [value|logits|0]
        value = slab[:, :a].astype(jnp.float32) if compute_value else None
        policy_logits = slab[:, a:2 * a].astype(jnp.float32) if compute_policy else None
        return value, policy_logits

    def __call__(self, state, compute_policy=True, compute_value=True, task_label=None):
        return self.forward(state, compute_policy, compute_value)

    def get_action(self, observation, key, task_label=None):
        # Categorical(logits=...).sample() equivalent; sampling stays in plain JAX.
        _, policy_logits = self(observation, compute_value=False, task_label=task_label)
        return jax.random.categorical(key, policy_logits, axis=-1)


def _reference_mlp3_bf16(x, params):
    """Pure-JAX per-head reference with the same bf16-input / f32-accumulate numerics."""
    w1, b1, w2, b2, w3, b3 = params

    def dot(a, w):
        return jnp.dot(a.astype(jnp.bfloat16), w.astype(jnp.bfloat16),
                       preferred_element_type=jnp.float32)

    h1 = jnp.maximum(dot(x, w1) + b1, 0.0)
    h2 = jnp.maximum(dot(h1, w2) + b2, 0.0)
    return dot(h2, w3) + b3


if __name__ == "__main__":
    key = jax.random.PRNGKey(0)
    k_model, k_x, k_x2, k_act = jax.random.split(key, 4)

    batch, num_inputs, num_actions = 8, 32, 6
    model = ActorCriticMLPPallas(num_inputs, num_actions, key=k_model)
    state = jax.random.normal(k_x, (batch, num_inputs), dtype=jnp.float32)

    value, policy_logits = model(state)
    value = jax.block_until_ready(value)
    policy_logits = jax.block_until_ready(policy_logits)

    # Correctness vs pure-JAX reference of the UNFUSED per-head MLPs (validates the
    # block-diagonal fusion, the Pallas kernel and the bf16 output rounding).
    tol = dict(atol=2e-2, rtol=2e-2)
    ref_value = _reference_mlp3_bf16(state, model.critic_params)
    ref_logits = _reference_mlp3_bf16(state, model.actor_params)
    assert value.shape == (batch, num_actions)
    assert policy_logits.shape == (batch, num_actions)
    assert jnp.allclose(value, ref_value, **tol), \
        float(jnp.max(jnp.abs(value - ref_value)))
    assert jnp.allclose(policy_logits, ref_logits, **tol), \
        float(jnp.max(jnp.abs(policy_logits - ref_logits)))

    # Ragged last block path (batch not a multiple of the tile; no wrapper pad/slice).
    state_ragged = jax.random.normal(k_x2, (20, num_inputs), dtype=jnp.float32)
    v_r, p_r = model(state_ragged)
    v_r = jax.block_until_ready(v_r)
    assert v_r.shape == (20, num_actions) and p_r.shape == (20, num_actions)
    assert jnp.allclose(v_r, _reference_mlp3_bf16(state_ragged, model.critic_params), **tol)
    assert jnp.allclose(p_r, _reference_mlp3_bf16(state_ragged, model.actor_params), **tol)

    # bf16 observation path (no in-kernel cast, half the input DMA bytes).
    state32 = jax.random.normal(jax.random.PRNGKey(7), (32, num_inputs), dtype=jnp.float32)
    v_bf, p_bf = model(state32.astype(jnp.bfloat16))
    v_bf = jax.block_until_ready(v_bf)
    assert jnp.allclose(v_bf, _reference_mlp3_bf16(state32, model.critic_params), **tol)
    assert jnp.allclose(p_bf, _reference_mlp3_bf16(state32, model.actor_params), **tol)

    # compute_value=False path (used by A2CModel.get_action) + sampling.
    v_none, logits_only = model(state, compute_value=False)
    assert v_none is None
    assert jnp.allclose(jax.block_until_ready(logits_only), policy_logits)
    actions = jax.block_until_ready(model.get_action(state, k_act))
    assert actions.shape == (batch,)

    print("KERNEL_OK")
</pallas_src>

<mosaic_0001>
module attributes {stable_mosaic.version = 11 : i64} {
  func.func @_fused_ac_kernel(%arg0: i32, %arg1: memref<16x32xf32, #tpu.memory_space<vmem>>, %arg2: memref<32x128xbf16, #tpu.memory_space<vmem>>, %arg3: memref<1x128xf32, #tpu.memory_space<vmem>>, %arg4: memref<128x128xbf16, #tpu.memory_space<vmem>>, %arg5: memref<1x128xf32, #tpu.memory_space<vmem>>, %arg6: memref<128x128xbf16, #tpu.memory_space<vmem>>, %arg7: memref<1x128xf32, #tpu.memory_space<vmem>>, %arg8: memref<16x128xbf16, #tpu.memory_space<vmem>>) attributes {dimension_semantics = [#tpu.dimension_semantics<parallel>], iteration_bounds = array<i64: 1>, scalar_prefetch = 0 : i64, scratch_operands = 0 : i64, tpu.core_type = #tpu.core_type<tc>, window_params = [{transform_indices = @transform_0, window_bounds = array<i64: 16, 32>}, {pipeline_mode = #tpu.pipeline_mode<synchronous>, transform_indices = @transform_1, window_bounds = array<i64: 32, 128>}, {pipeline_mode = #tpu.pipeline_mode<synchronous>, transform_indices = @transform_2, window_bounds = array<i64: 1, 128>}, {pipeline_mode = #tpu.pipeline_mode<synchronous>, transform_indices = @transform_3, window_bounds = array<i64: 128, 128>}, {pipeline_mode = #tpu.pipeline_mode<synchronous>, transform_indices = @transform_4, window_bounds = array<i64: 1, 128>}, {pipeline_mode = #tpu.pipeline_mode<synchronous>, transform_indices = @transform_5, window_bounds = array<i64: 128, 128>}, {pipeline_mode = #tpu.pipeline_mode<synchronous>, transform_indices = @transform_6, window_bounds = array<i64: 1, 128>}, {transform_indices = @transform_7, window_bounds = array<i64: 16, 128>}]} {
    %c0 = arith.constant 0 : index
    %c0_0 = arith.constant 0 : index
    %0 = vector.load %arg1[%c0, %c0_0] : memref<16x32xf32, #tpu.memory_space<vmem>>, vector<16x32xf32>
    %1 = arith.truncf %0 : vector<16x32xf32> to vector<16x32xbf16>
    %c0_1 = arith.constant 0 : index
    %c0_2 = arith.constant 0 : index
    %2 = vector.load %arg2[%c0_1, %c0_2] : memref<32x128xbf16, #tpu.memory_space<vmem>>, vector<32x128xbf16>
    %cst = arith.constant dense<0.000000e+00> : vector<16x128xf32>
    %3 = tpu.matmul %1, %2, %cst {dimension_numbers = #tpu.dot_dimension_numbers<[1], [0], [0], [1], [0, 0, 1, 1], [], []>} : vector<16x32xbf16>, vector<32x128xbf16>, vector<16x128xf32> -> vector<16x128xf32>
    %c0_3 = arith.constant 0 : index
    %c0_4 = arith.constant 0 : index
    %4 = vector.load %arg3[%c0_3, %c0_4] : memref<1x128xf32, #tpu.memory_space<vmem>>, vector<1x128xf32>
    %5 = vector.broadcast %4 : vector<1x128xf32> to vector<16x128xf32>
    %6 = arith.addf %3, %5 : vector<16x128xf32>
    %cst_5 = arith.constant 0.000000e+00 : f32
    %7 = vector.broadcast %cst_5 : f32 to vector<16x128xf32>
    %8 = arith.maximumf %6, %7 : vector<16x128xf32>
    %9 = arith.truncf %8 : vector<16x128xf32> to vector<16x128xbf16>
    %c0_6 = arith.constant 0 : index
    %c0_7 = arith.constant 0 : index
    %10 = vector.load %arg4[%c0_6, %c0_7] : memref<128x128xbf16, #tpu.memory_space<vmem>>, vector<128x128xbf16>
    %cst_8 = arith.constant dense<0.000000e+00> : vector<16x128xf32>
    %11 = tpu.matmul %9, %10, %cst_8 {dimension_numbers = #tpu.dot_dimension_numbers<[1], [0], [0], [1], [0, 0, 1, 1], [], []>} : vector<16x128xbf16>, vector<128x128xbf16>, vector<16x128xf32> -> vector<16x128xf32>
    %c0_9 = arith.constant 0 : index
    %c0_10 = arith.constant 0 : index
    %12 = vector.load %arg5[%c0_9, %c0_10] : memref<1x128xf32, #tpu.memory_space<vmem>>, vector<1x128xf32>
    %13 = vector.broadcast %12 : vector<1x128xf32> to vector<16x128xf32>
    %14 = arith.addf %11, %13 : vector<16x128xf32>
    %cst_11 = arith.constant 0.000000e+00 : f32
    %15 = vector.broadcast %cst_11 : f32 to vector<16x128xf32>
    %16 = arith.maximumf %14, %15 : vector<16x128xf32>
    %17 = arith.truncf %16 : vector<16x128xf32> to vector<16x128xbf16>
    %c0_12 = arith.constant 0 : index
    %c0_13 = arith.constant 0 : index
    %18 = vector.load %arg6[%c0_12, %c0_13] : memref<128x128xbf16, #tpu.memory_space<vmem>>, vector<128x128xbf16>
    %cst_14 = arith.constant dense<0.000000e+00> : vector<16x128xf32>
    %19 = tpu.matmul %17, %18, %cst_14 {dimension_numbers = #tpu.dot_dimension_numbers<[1], [0], [0], [1], [0, 0, 1, 1], [], []>} : vector<16x128xbf16>, vector<128x128xbf16>, vector<16x128xf32> -> vector<16x128xf32>
    %c0_15 = arith.constant 0 : index
    %c0_16 = arith.constant 0 : index
    %20 = vector.load %arg7[%c0_15, %c0_16] : memref<1x128xf32, #tpu.memory_space<vmem>>, vector<1x128xf32>
    %21 = vector.broadcast %20 : vector<1x128xf32> to vector<16x128xf32>
    %22 = arith.addf %19, %21 : vector<16x128xf32>
    %23 = arith.truncf %22 : vector<16x128xf32> to vector<16x128xbf16>
    %c0_17 = arith.constant 0 : index
    %c0_18 = arith.constant 0 : index
    %24 = vector.load %arg8[%c0_17, %c0_18] : memref<16x128xbf16, #tpu.memory_space<vmem>>, vector<16x128xbf16>
    tpu.vector_store %arg8[%c0_17, %c0_18], %23 {strides = array<i32>} : memref<16x128xbf16, #tpu.memory_space<vmem>>, vector<16x128xbf16>,
    return
  }
  func.func @transform_0(%arg0: i32) -> (i32, i32) {
    %c0_i32 = arith.constant 0 : i32
    %c0_i32_0 = arith.constant 0 : i32
    return %arg0, %c0_i32 : i32, i32
  }
  func.func @transform_1(%arg0: i32) -> (i32, i32) {
    %c0_i32 = arith.constant 0 : i32
    %c0_i32_0 = arith.constant 0 : i32
    %c0_i32_1 = arith.constant 0 : i32
    return %c0_i32, %c0_i32_0 : i32, i32
  }
  func.func @transform_2(%arg0: i32) -> (i32, i32) {
    %c0_i32 = arith.constant 0 : i32
    %c0_i32_0 = arith.constant 0 : i32
    %c0_i32_1 = arith.constant 0 : i32
    return %c0_i32, %c0_i32_0 : i32, i32
  }
  func.func @transform_3(%arg0: i32) -> (i32, i32) {
    %c0_i32 = arith.constant 0 : i32
    %c0_i32_0 = arith.constant 0 : i32
    %c0_i32_1 = arith.constant 0 : i32
    return %c0_i32, %c0_i32_0 : i32, i32
  }
  func.func @transform_4(%arg0: i32) -> (i32, i32) {
    %c0_i32 = arith.constant 0 : i32
    %c0_i32_0 = arith.constant 0 : i32
    %c0_i32_1 = arith.constant 0 : i32
    return %c0_i32, %c0_i32_0 : i32, i32
  }
  func.func @transform_5(%arg0: i32) -> (i32, i32) {
    %c0_i32 = arith.constant 0 : i32
    %c0_i32_0 = arith.constant 0 : i32
    %c0_i32_1 = arith.constant 0 : i32
    return %c0_i32, %c0_i32_0 : i32, i32
  }
  func.func @transform_6(%arg0: i32) -> (i32, i32) {
    %c0_i32 = arith.constant 0 : i32
    %c0_i32_0 = arith.constant 0 : i32
    %c0_i32_1 = arith.constant 0 : i32
    return %c0_i32, %c0_i32_0 : i32, i32
  }
  func.func @transform_7(%arg0: i32) -> (i32, i32) {
    %c0_i32 = arith.constant 0 : i32
    %c0_i32_0 = arith.constant 0 : i32
    return %arg0, %c0_i32 : i32, i32
  }
}

</mosaic_0001>

<bundles_post_ra>
// kernel: forward.1
= control target key start
LH: loop header
LB: loop body
LE: loop exit
PB: predicated region body
PF: predicated region fallthrough
CT: control target
= control target key end

     0   :  { %12 = vsyncpa [#allocation3], 0  ;;  %s747_s0 = inlined_call_operand.vmem [shape: f32[8,32], index: 0, kind: input, shape index: {}]   ;;  %s748_s1 = inlined_call_operand.vmem [shape: bf16[32,128], index: 1, kind: input, shape index: {}]   ;;  %s749_s2 = inlined_call_operand.hbm [shape: f32[1,128], index: 2, kind: input, shape index: {}]   ;;  %s750_s3 = inlined_call_operand.hbm [shape: bf16[128,128], index: 3, kind: input, shape index: {}]   ;;  %s751_s4 = inlined_call_operand.vmem [shape: f32[1,128], index: 4, kind: input, shape index: {}]   ;;  %s752_s5 = inlined_call_operand.hbm [shape: bf16[128,128], index: 5, kind: input, shape index: {}]   ;;  %s753_s6 = inlined_call_operand.vmem [shape: f32[1,128], index: 6, kind: input, shape index: {}]   ;;  %s754_s7 = inlined_call_operand.vmem [shape: bf16[8,128], index: 7, kind: output, shape index: {}]  }
   0x1   :  { %13 = vsyncpa [#allocation5], 0  ;;  %s613_s24 = smov [#allocation4]   ;;  %s543_s28 = scalar_lea.hbm %s750_s3, 1024 }
   0x2   :  { %s33_s25 = sshll.u32 %s613_s24, 4  ;;  %p544_p0 = scmp.ne.s32.totalorder %s750_s3, %s543_s28  ;;  %s34_s25 = int_to_ptr.vmem [resolvable:$true] %s33_s25 }
   0x3   :  { %p547_p1 = scmp.lt.u32.totalorder %s543_s28, %s750_s3 }
   0x5   :  { %p549_p2 = pnand %p547_p1, %p544_p0 }
   0x7   :  { %552 = shalt.err (!%p549_p2)
}
   0x8   :  { %s553_s10 = scalar_lea.vmem %s34_s25, 1024  ;;  %p558_p4 = scmp.lt.s32.totalorder %s34_s25, %s34_s25 }
   0x9   :  { %p554_p3 = scmp.ne.s32.totalorder %s34_s25, %s553_s10  ;;  %p559_p5 = scmp.lt.s32.totalorder %s553_s10, %s553_s10 }
   0xb   :  { %p560_p6 = por %p559_p5, %p558_p4 }
   0xd   :  { %p561_p7 = pnand %p560_p6, %p554_p3 }
   0xf   :  { %564 = shalt.err (!%p561_p7)
}
  0x10   :  { %s614_s11 = smov 64   ;;  %s615_s12 = smov 4  }
  0x11   :  { %39 = dma.hbm_to_vmem [thread:$0]  %s750_s3, 1024, %s34_s25, [#allocation5], %s614_s11, %s614_s11, %s615_s12  }
  0x12   :  { %s616_s15 = smov [#allocation2]   ;;  %s617_s17 = smov [#allocation6]  }
  0x13   :  { %s24_s16 = sshll.u32 %s616_s15, 4  ;;  %s47_s18 = sshll.u32 %s617_s17, 4  ;;  %s25_s16 = int_to_ptr.vmem [resolvable:$true] %s24_s16  ;;  %s48_s18 = int_to_ptr.vmem [resolvable:$true] %s47_s18 }
  0x14   :  { %s565_s21 = scalar_lea.hbm %s749_s2, 16 }
  0x15   :  { %p566_p8 = scmp.ne.s32.totalorder %s749_s2, %s565_s21  ;;  %p569_p9 = scmp.lt.u32.totalorder %s565_s21, %s749_s2 }
  0x17   :  { %p571_p10 = pnand %p569_p9, %p566_p8 }
  0x19   :  { %574 = shalt.err (!%p571_p10)
}
  0x1a   :  { %s575_s3 = scalar_lea.vmem %s25_s16, 16  ;;  %s579_s25 = scalar_lea.vmem %s25_s16, 32 }
  0x1b   :  { %p576_p11 = scmp.ne.s32.totalorder %s25_s16, %s575_s3  ;;  %p580_p12 = scmp.lt.s32.totalorder %s25_s16, %s25_s16 }
  0x1c   :  { %p581_p13 = scmp.lt.s32.totalorder %s579_s25, %s575_s3 }
  0x1e   :  { %p582_p0 = por %p581_p13, %p580_p12 }
  0x20   :  { %p583_p1 = pnand %p582_p0, %p576_p11 }
  0x22   :  { %586 = shalt.err (!%p583_p1)
}
  0x23   :  { %27 = dma.hbm_to_vmem [thread:$0]  %s749_s2, 16, %s25_s16, [#allocation3]  }
  0x24   :  { %s587_s8 = scalar_lea.hbm %s752_s5, 1024 }
  0x25   :  { %p588_p2 = scmp.ne.s32.totalorder %s752_s5, %s587_s8  ;;  %p591_p3 = scmp.lt.u32.totalorder %s587_s8, %s752_s5 }
  0x27   :  { %p593_p4 = pnand %p591_p3, %p588_p2 }
  0x29   :  { %596 = shalt.err (!%p593_p4)
}
  0x2a   :  { %s597_s15 = scalar_lea.vmem %s48_s18, 1024  ;;  %p602_p6 = scmp.lt.s32.totalorder %s48_s18, %s48_s18 }
  0x2b   :  { %p598_p5 = scmp.ne.s32.totalorder %s48_s18, %s597_s15  ;;  %p603_p7 = scmp.lt.s32.totalorder %s597_s15, %s597_s15 }
  0x2d   :  { %p604_p8 = por %p603_p7, %p602_p6 }
  0x2f   :  { %p605_p9 = pnand %p604_p8, %p598_p5 }
  0x31   :  { %608 = shalt.err (!%p605_p9)
}
  0x32   :  { %53 = dma.hbm_to_vmem [thread:$0]  %s752_s5, 1024, %s48_s18, [#allocation5], %s614_s11, %s614_s11, %s615_s12  }
  0x33   :  { %609 = dma.done.wait [#allocation3], 16  }
  0x34   :  { %610 = vsyncadd [#allocation3], 4294967280 }
  0x35   :  { %611 = dma.done.wait [#allocation5], 2048  }
  0x36   :  { %612 = vsyncadd [#allocation5], 4294965248  ;;  %v618_v0 = vmov 0.0   ;;  %vm619_vm0 = vmmov 0   ;;  %v525_v1 = vld [vmem:[%s748_s1] sm:$0xff]   ;;  %v526_v2 = vld [vmem:[%s748_s1 + $0x8] sm:$0xff]  }
  0x37   :  { %470 = vmatprep.subr.bf16.mxu0 %v618_v0  ;;  %474 = vmatprep.mubr.msk.bf16.mxu0 %vm619_vm0, %v618_v0  ;;  %v66_v3 = vld [vmem:[%s747_s0] sm:$0xff]  ;;  %v67_v4 = vld [vmem:[%s747_s0 + $0x8] sm:$0xff]  ;;  %vm92_vm1 = vcmask 261120   ;;  %v529_v8 = vld [vmem:[#allocation4 + $0x10] sm:$0xff]  }
  0x38   :  { %478 = vmatprep.subr.bf16.mxu1 %v618_v0  ;;  %494 = vmatprep.mubr.msk.bf16.mxu1 %vm619_vm0, %v618_v0  ;;  %v527_v5 = vld [vmem:[#allocation4] sm:$0xff]   ;;  %v68_v6 = vpack.c.bf16 %v67_v4, %v66_v3  ;;  %v528_v7 = vld [vmem:[#allocation4 + $0x8] sm:$0xff]   ;;  %v530_v9 = vld [vmem:[#allocation4 + $0x18] sm:$0xff]  }
  0x39   :  { %471 = vmatpush3.bf16.msra.mxu0 %v525_v1  ;;  %479 = vmatpush3.bf16.msra.mxu1 %v527_v5  ;;  %v531_v10 = vld [vmem:[#allocation4 + $0x20] sm:$0xff]   ;;  %v532_v11 = vld [vmem:[#allocation4 + $0x28] sm:$0xff]   ;;  %v533_v12 = vld [vmem:[#allocation4 + $0x30] sm:$0xff]  }
  0x3a   :  { %472 = vmatprep.subr.bf16.mxu0 %v618_v0  ;;  %480 = vmatprep.subr.bf16.mxu1 %v618_v0  ;;  %v534_v13 = vld [vmem:[#allocation4 + $0x38] sm:$0xff]   ;;  %v535_v14 = vld [vmem:[#allocation6] sm:$0xff]   ;;  %v536_v15 = vld [vmem:[#allocation6 + $0x8] sm:$0xff]  }
  0x3b   :  { %v537_v16 = vld [vmem:[#allocation6 + $0x10] sm:$0xff]   ;;  %v538_v17 = vld [vmem:[#allocation6 + $0x18] sm:$0xff]   ;;  %v539_v18 = vld [vmem:[#allocation6 + $0x20] sm:$0xff]  }
  0x3c   :  { %v540_v19 = vld [vmem:[#allocation6 + $0x28] sm:$0xff]   ;;  %v418_v20 = vld [vmem:[#allocation2] ss:$0 sm:$0xff]  ;;  %v541_v30 = vld [vmem:[#allocation6 + $0x30] sm:$0xff]  }
  0x3d   :  { %473 = vmatpush3.bf16.msra.mxu0 %v526_v2  ;;  %481 = vmatpush3.bf16.msra.mxu1 %v528_v7  ;;  %v542_v31 = vld [vmem:[#allocation6 + $0x38] sm:$0xff]  }
  0x3e   :  { %498 = vmatprep.subr.bf16.mxu0 %v618_v0  ;;  %482 = vmatprep.subr.bf16.mxu1 %v618_v0  ;;  %v422_v32 = vld [vmem:[%s751_s4] ss:$0 sm:$0xff] }
  0x3f   :  { %v431_v42 = vld [vmem:[%s753_s6] ss:$0 sm:$0xff] }
  0x40   :  { %475 = vmatmul.mubr.msk.bf16.vlgmr.msra.gmra.mrb[0].mxu0 %vm92_vm1, %v68_v6 }
  0x41   :  { %514 = vmatprep.mubr.msk.bf16.mxu0 %vm619_vm0, %v618_v0  ;;  %483 = vmatpush3.bf16.msra.mxu1 %v529_v8 }
  0x42   :  { %484 = vmatprep.subr.bf16.mxu1 %v618_v0  ;;  %499 = vmatpush3.bf16.msra.mxu0 %v535_v14 }
  0x43   :  { %500 = vmatprep.subr.bf16.mxu0 %v618_v0 }
  0x45   :  { %485 = vmatpush3.bf16.msra.mxu1 %v530_v9 }
  0x46   :  { %486 = vmatprep.subr.bf16.mxu1 %v618_v0  ;;  %501 = vmatpush3.bf16.msra.mxu0 %v536_v15 }
  0x47   :  { %502 = vmatprep.subr.bf16.mxu0 %v618_v0 }
  0x49   :  { %487 = vmatpush3.bf16.msra.mxu1 %v531_v10 }
  0x4a   :  { %488 = vmatprep.subr.bf16.mxu1 %v618_v0  ;;  %503 = vmatpush3.bf16.msra.mxu0 %v537_v16 }
  0x4b   :  { %504 = vmatprep.subr.bf16.mxu0 %v618_v0 }
  0x4d   :  { %489 = vmatpush3.bf16.msra.mxu1 %v532_v11 }
  0x4e   :  { %490 = vmatprep.subr.bf16.mxu1 %v618_v0  ;;  %505 = vmatpush3.bf16.msra.mxu0 %v538_v17 }
  0x4f   :  { %506 = vmatprep.subr.bf16.mxu0 %v618_v0 }
  0x51   :  { %491 = vmatpush3.bf16.msra.mxu1 %v533_v12 }
  0x52   :  { %492 = vmatprep.subr.bf16.mxu1 %v618_v0  ;;  %507 = vmatpush3.bf16.msra.mxu0 %v539_v18 }
  0x53   :  { %508 = vmatprep.subr.bf16.mxu0 %v618_v0 }
  0x55   :  { %493 = vmatpush3.bf16.msra.mxu1 %v534_v13 }
  0x56   :  { %509 = vmatpush3.bf16.msra.mxu0 %v540_v19 }
  0x57   :  { %510 = vmatprep.subr.bf16.mxu0 %v618_v0 }
  0x5a   :  { %511 = vmatpush3.bf16.msra.mxu0 %v541_v30 }
  0x5b   :  { %512 = vmatprep.subr.bf16.mxu0 %v618_v0 }
  0x5e   :  { %513 = vmatpush3.bf16.msra.mxu0 %v542_v31 }
 0x113   :  { %v130_v21 = vpop.f32.mrb[0].mxu0 }
 0x114   :  { %v131_v22 = vadd.f32 %v418_v20, %v130_v21  ;;  %v476_v23 = vpop.f32.mrb[1].mxu0 }
 0x115   :  { %v133_v24 = vpop.f32.mrb[2].mxu0 }
 0x116   :  { %v134_v25 = vadd.f32 %v418_v20, %v133_v24  ;;  %v477_v26 = vpop.f32.mrb[3].mxu0  ;;  %v137_v27 = vmax.f32 %v131_v22, 0.0 }
 0x118   :  { %v138_v28 = vmax.f32 %v134_v25, 0.0 }
 0x11a   :  { %v139_v29 = vpack.c.bf16 %v138_v28, %v137_v27 }
 0x11c   :  { %495 = vmatmul.mubr.bf16.vlgmr.msra.gmra.mrb[0].mxu1 %v139_v29 }
 0x1ef   :  { %v245_v33 = vpop.f32.mrb[0].mxu1 }
 0x1f0   :  { %v246_v34 = vadd.f32 %v422_v32, %v245_v33  ;;  %v496_v35 = vpop.f32.mrb[1].mxu1 }
 0x1f1   :  { %v248_v36 = vpop.f32.mrb[2].mxu1 }
 0x1f2   :  { %v249_v37 = vadd.f32 %v422_v32, %v248_v36  ;;  %v497_v38 = vpop.f32.mrb[3].mxu1  ;;  %v252_v39 = vmax.f32 %v246_v34, 0.0 }
 0x1f4   :  { %v253_v40 = vmax.f32 %v249_v37, 0.0 }
 0x1f6   :  { %v254_v41 = vpack.c.bf16 %v253_v40, %v252_v39 }
 0x1f8   :  { %515 = vmatmul.mubr.bf16.vlgmr.msra.gmra.mrb[4].mxu0 %v254_v41 }
 0x2cb   :  { %v360_v43 = vpop.f32.mrb[4].mxu0 }
 0x2cc   :  { %v516_v44 = vpop.f32.mrb[5].mxu0  ;;  %v361_v46 = vadd.f32 %v431_v42, %v360_v43 }
 0x2cd   :  { %v363_v45 = vpop.f32.mrb[6].mxu0 }
 0x2ce   :  { %v364_v47 = vadd.f32 %v431_v42, %v363_v45  ;;  %v517_v48 = vpop.f32.mrb[7].mxu0 }
 0x2d0   :  { %v447_v49 = vpack.c.bf16 %v364_v47, %v361_v46 }
 0x2d2   :  { %448 = vst [vmem:[#allocation7] sm:$0xff] %v447_v49  }
 0x2d9   :  { %v394_v50 = vld [vmem:[#allocation7] sm:$0xf] }
 0x2da   :  { %395 = vst [vmem:[%s754_s7] sm:$0xf] %v394_v50 }
 0x2db   :  { %412 = vsyncpa [#allocation3], 1 }
 0x2dc   :  { %413 = vsyncpa [#allocation5], 1 }

</bundles_post_ra>
